<compile_context>
chip_gen: v5e
topology: v5e:2x2
jax: 0.10.0
libtpu: 0.0.40
codegen_flags: <defaults>
</compile_context>

<pallas_src>
import functools

import jax
import jax.numpy as jnp
import numpy as np
from jax import lax
from jax.experimental import pallas as pl
from jax.experimental.pallas import tpu as pltpu

_N_TAPS = 9  # 3x3 kernel


# ----------------------------------------------------------------------------
# Pallas kernel 1: global average pool + 1x1 conv + (folded) BN + ReLU
# ----------------------------------------------------------------------------
def _gap_img_kernel(x_ref, w_ref, b_ref, o_ref, sum_ref, *, inv_hw):
    k = pl.program_id(1)

    @pl.when(k == 0)
    def _():
        sum_ref[...] = jnp.zeros_like(sum_ref)

    # x_ref: (1, thw, Cin) bf16 -> accumulate the spatial sum in f32.
    sum_ref[...] += jnp.sum(x_ref[0].astype(jnp.float32), axis=0, keepdims=True)

    @pl.when(k == pl.num_programs(1) - 1)
    def _():
        mean = sum_ref[...] * inv_hw                                   # (1, Cin) f32
        y = jnp.dot(mean, w_ref[...], preferred_element_type=jnp.float32)
        o_ref[...] = jnp.maximum(y + b_ref[...], 0.0).reshape(1, 1, -1)


def _pick_hw_tile(total, cap=2048):
    if total <= cap:
        return total
    for cand in range(cap - cap % 8, 0, -8):
        if total % cand == 0:
            return cand
    return total


def gap_img_branch(x_rows, w_img, b_img, *, block_hw=None):
    """x_rows: (N, H*W, Cin) bf16 -> (N, 1, R) f32 pooled branch features."""
    N, HW, Cin = x_rows.shape
    R = w_img.shape[1]
    thw = block_hw if block_hw is not None else _pick_hw_tile(HW)
    assert HW % thw == 0, (HW, thw)
    kernel = functools.partial(_gap_img_kernel, inv_hw=1.0 / HW)
    return pl.pallas_call(
        kernel,
        out_shape=jax.ShapeDtypeStruct((N, 1, R), jnp.float32),
        grid_spec=pltpu.PrefetchScalarGridSpec(
            num_scalar_prefetch=0,
            grid=(N, HW // thw),
            in_specs=[
                pl.BlockSpec((1, thw, Cin), lambda b, k: (b, k, 0)),
                pl.BlockSpec((Cin, R), lambda b, k: (0, 0)),
                pl.BlockSpec((1, R), lambda b, k: (0, 0)),
            ],
            out_specs=pl.BlockSpec((1, 1, R), lambda b, k: (b, 0, 0)),
            scratch_shapes=[pltpu.VMEM((1, Cin), jnp.float32)],
        ),
        compiler_params=pltpu.CompilerParams(
            dimension_semantics=("parallel", "arbitrary"),
            vmem_limit_bytes=32 * 1024 * 1024),
    )(x_rows, w_img, b_img)


# ----------------------------------------------------------------------------
# Pallas kernel 2: fused 1x1 + three dilated 3x3 branches (tap reduction) with
# image-pool / edge branches folded into the epilogue -> one (rows, 6R) block.
# ----------------------------------------------------------------------------
def _fused_branches_kernel(xpad_hbm, wd_ref, w1_ref, wedge_ref, img_ref,
                           edge_ref, bias_ref, o_ref,
                           xbuf, sems, acc_ref,
                           *, rates, pad, th, W, Cin, R, nr):
    b = pl.program_id(0)
    h = pl.program_id(1)
    t = pl.program_id(2)
    rows = th * W
    slot = t % 2

    def tap_copy(tap, slot_, i, r):
        ki = tap // 3
        kj = tap - ki * 3
        off_h = h * th + pad + (ki - 1) * r
        off_w = pad + (kj - 1) * r
        return pltpu.make_async_copy(
            xpad_hbm.at[b, pl.ds(off_h, th), pl.ds(off_w, W), :],
            xbuf.at[slot_, i],
            sems.at[slot_, i])

    def start_tap(tap, slot_):
        for i, r in enumerate(rates):
            tap_copy(tap, slot_, i, r).start()

    # First tap of this (b, h) tile: prime the DMA pipeline, clear accumulators.
    @pl.when(t == 0)
    def _():
        start_tap(0, 0)
        acc_ref[...] = jnp.zeros_like(acc_ref)

    # Prefetch the next tap's shifted windows into the other buffer slot.
    @pl.when(t + 1 < _N_TAPS)
    def _():
        start_tap(t + 1, 1 - slot)

    # Wait for this tap's windows.
    for i, r in enumerate(rates):
        tap_copy(t, slot, i, r).wait()

    # Accumulate one (rows, Cin) @ (Cin, R) matmul per dilated branch (bf16
    # operands, f32 accumulation; BN scale already folded into the weights).
    for i in range(nr):
        xi = xbuf[slot, i].reshape(rows, Cin)
        wi = wd_ref[0, :, i * R:(i + 1) * R]
        acc_ref[1 + i] = acc_ref[1 + i] + jnp.dot(
            xi, wi, preferred_element_type=jnp.float32)

    # Centre tap (ki=kj=1) reads the un-shifted input -> also feed the 1x1 branch.
    @pl.when(t == (_N_TAPS - 1) // 2)
    def _():
        x_c = xbuf[slot, 0].reshape(rows, Cin)
        acc_ref[0] = acc_ref[0] + jnp.dot(
            x_c, w1_ref[...], preferred_element_type=jnp.float32)

    # Last tap: bias + ReLU epilogue; image-pool broadcast and the rank-1 edge
    # branch are computed on the VPU here, and the whole lane-dense (rows, 6R)
    # output block is written once.
    @pl.when(t == _N_TAPS - 1)
    def _():
        bias = bias_ref[...]                                   # (1, 6R) f32
        parts = [
            jnp.broadcast_to(img_ref[0], (rows, R)),           # image pooling
            jnp.maximum(edge_ref[0] * wedge_ref[...]           # edge (VPU)
                        + bias[:, R:2 * R], 0.0),
        ]
        for i in range(1 + nr):                                # 1x1 + dilated
            c0 = (2 + i) * R
            parts.append(jnp.maximum(acc_ref[i] + bias[:, c0:c0 + R], 0.0))
        o_ref[0] = jnp.concatenate(parts, axis=-1)


def _pick_block_h(H, W, target_rows=512):
    cands = [th for th in range(1, H + 1) if H % th == 0]
    good = [th for th in cands if th * W <= target_rows and (th * W) % 8 == 0]
    if good:
        return max(good)
    return H


def fused_branches(xpad, wd, w1, wedge, img, edge_rows, bias_all, *,
                   H, W, Cin, R, rates, pad, block_h=None):
    N = xpad.shape[0]
    nr = len(rates)
    cout = (3 + nr) * R
    th = block_h if block_h is not None else _pick_block_h(H, W)
    assert H % th == 0, (H, th)
    n_h = H // th
    rows = th * W

    # TODO(synk): for very large Cin an additional Cin-tiling grid axis would be
    # needed; here the 9-tap axis already splits the 9*Cin contraction.
    kernel = functools.partial(
        _fused_branches_kernel, rates=tuple(rates), pad=pad, th=th, W=W,
        Cin=Cin, R=R, nr=nr)

    return pl.pallas_call(
        kernel,
        out_shape=jax.ShapeDtypeStruct((N, H * W, cout), jnp.float32),
        grid_spec=pltpu.PrefetchScalarGridSpec(
            num_scalar_prefetch=0,
            grid=(N, n_h, _N_TAPS),
            in_specs=[
                pl.BlockSpec(memory_space=pl.ANY),                          # padded x (HBM)
                pl.BlockSpec((1, Cin, nr * R), lambda b, h, t: (t, 0, 0)),  # per-tap dilated W
                pl.BlockSpec((Cin, R), lambda b, h, t: (0, 0)),             # 1x1 W
                pl.BlockSpec((1, R), lambda b, h, t: (0, 0)),               # edge W (f32)
                pl.BlockSpec((1, 1, R), lambda b, h, t: (b, 0, 0)),         # pooled feats
                pl.BlockSpec((1, rows, 1), lambda b, h, t: (b, h, 0)),      # resized edge
                pl.BlockSpec((1, cout), lambda b, h, t: (0, 0)),            # biases
            ],
            out_specs=pl.BlockSpec((1, rows, cout), lambda b, h, t: (b, h, 0)),
            scratch_shapes=[
                pltpu.VMEM((2, nr, th, W, Cin), jnp.bfloat16),  # double-buffered taps
                pltpu.SemaphoreType.DMA((2, nr)),
                pltpu.VMEM((1 + nr, rows, R), jnp.float32),     # branch accumulators
            ],
        ),
        compiler_params=pltpu.CompilerParams(
            dimension_semantics=("parallel", "parallel", "arbitrary"),
            vmem_limit_bytes=32 * 1024 * 1024),
    )(xpad, wd, w1, wedge, img, edge_rows, bias_all)


# ----------------------------------------------------------------------------
# Plain-JAX glue
# ----------------------------------------------------------------------------
def bilinear_align_corners(x, out_h, out_w):
    """F.interpolate(..., mode='bilinear', align_corners=True). x: NCHW."""
    N, C, H, W = x.shape

    def coords(out_size, in_size):
        if in_size == 1 or out_size == 1:
            src = jnp.zeros((out_size,), jnp.float32)
        else:
            src = jnp.arange(out_size, dtype=jnp.float32) * (in_size - 1) / (out_size - 1)
        i0 = jnp.clip(jnp.floor(src).astype(jnp.int32), 0, in_size - 1)
        i1 = jnp.clip(i0 + 1, 0, in_size - 1)
        frac = src - i0.astype(jnp.float32)
        return i0, i1, frac

    y0, y1, fy = coords(out_h, H)
    x0, x1, fx = coords(out_w, W)
    top = x[:, :, y0, :]
    bot = x[:, :, y1, :]
    rows = top * (1.0 - fy)[None, None, :, None] + bot * fy[None, None, :, None]
    left = rows[:, :, :, x0]
    right = rows[:, :, :, x1]
    return left * (1.0 - fx)[None, None, None, :] + right * fx[None, None, None, :]


def fold_bn(gamma, beta, mean, var, eps=1e-5):
    scale = gamma / jnp.sqrt(var + eps)
    bias = beta - mean * scale
    return scale, bias


# ----------------------------------------------------------------------------
# Parameter construction (deterministic, synthetic; BN scale folded into W)
# ----------------------------------------------------------------------------
def make_params(key, in_dim, reduction_dim=32, output_stride=16, rates=(6, 12, 18)):
    if output_stride == 8:
        rates = tuple(2 * r for r in rates)
    elif output_stride != 16:
        raise ValueError(f"output stride of {output_stride} not supported")
    R = reduction_dim
    nr = len(rates)

    def bn(k, r):
        k1, k2, k3, k4 = jax.random.split(k, 4)
        gamma = jax.random.uniform(k1, (r,), minval=0.5, maxval=1.5)
        beta = 0.1 * jax.random.normal(k2, (r,))
        mean = 0.1 * jax.random.normal(k3, (r,))
        var = jax.random.uniform(k4, (r,), minval=0.5, maxval=1.5)
        return fold_bn(gamma, beta, mean, var)

    keys = jax.random.split(key, 6 + 2 * nr)
    p = {"reduction_dim": R, "rates": list(rates)}

    # image-pooling branch: 1x1 conv (R, Cin) + BN   (tiny -> keep f32)
    w = 0.1 * jax.random.normal(keys[0], (R, in_dim))
    s, b = bn(keys[1], R)
    p["w_img"] = (w.T * s[None, :]).astype(jnp.float32)        # (Cin, R), scale folded
    p["b_img"] = b.reshape(1, R).astype(jnp.float32)

    # edge branch: 1x1 conv (R, 1) + BN   (VPU path -> f32)
    w = 0.1 * jax.random.normal(keys[2], (R, 1))
    s, b = bn(keys[3], R)
    p["w_edge_oihw"], p["s_edge"], p["b_edge"] = w.reshape(R, 1, 1, 1), s, b
    p["w_edge"] = (w.T * s[None, :]).astype(jnp.float32)       # (1, R), scale folded

    # features[0]: 1x1 conv (R, Cin) + BN
    w = 0.1 * jax.random.normal(keys[4], (R, in_dim))
    s, b = bn(keys[5], R)
    p["w_1x1_oihw"], p["s_1x1"], p["b_1x1"] = w.reshape(R, in_dim, 1, 1), s, b
    p["w_1x1"] = (w.T * s[None, :]).astype(jnp.bfloat16)       # (Cin, R), scale folded

    # features[1..]: dilated 3x3 convs + BN, stacked per-tap as (9, Cin, nr*R)
    wd_cols, p["w_d_oihw"], p["s_d"], p["b_d"] = [], [], [], []
    for i in range(nr):
        w = 0.1 * jax.random.normal(keys[6 + 2 * i], (R, in_dim, 3, 3))
        s, b = bn(keys[7 + 2 * i], R)
        p["w_d_oihw"].append(w)
        p["s_d"].append(s)
        p["b_d"].append(b)
        w_t = jnp.transpose(w, (2, 3, 1, 0)).reshape(9, in_dim, R)  # (tap, Cin, R)
        wd_cols.append(w_t * s[None, None, :])
    p["wd_stack"] = jnp.concatenate(wd_cols, axis=-1).astype(jnp.bfloat16)

    # biases laid out in final channel order: [img(0s), edge, 1x1, d0, d1, d2]
    bias_all = jnp.concatenate(
        [jnp.zeros((R,), jnp.float32), p["b_edge"], p["b_1x1"]] + list(p["b_d"]))
    p["bias_all"] = bias_all.reshape(1, (3 + nr) * R).astype(jnp.float32)
    return p


# ----------------------------------------------------------------------------
# ASPP forward (Pallas)
# ----------------------------------------------------------------------------
def aspp_forward(x_nchw, edge_nchw, params, *, block_h=None, block_hw=None):
    N, Cin, H, W = x_nchw.shape
    R = params["reduction_dim"]
    rates = tuple(params["rates"])
    nr = len(rates)
    pad = max(rates)
    cout = (3 + nr) * R

    x_nhwc = jnp.transpose(x_nchw, (0, 2, 3, 1)).astype(jnp.bfloat16)

    # image pooling + 1x1 conv + BN + ReLU (tiled Pallas reduction)
    img = gap_img_branch(x_nhwc.reshape(N, H * W, Cin), params["w_img"],
                         params["b_img"], block_hw=block_hw)           # (N, 1, R) f32

    # edge bilinear resize (align_corners=True): gather glue in plain JAX
    edge_rs = bilinear_align_corners(edge_nchw.astype(jnp.float32), H, W)
    edge_rows = jnp.transpose(edge_rs, (0, 2, 3, 1)).reshape(N, H * W, 1)

    # zero-pad x once; the dilated taps read shifted windows via in-kernel DMA
    xpad = jnp.pad(x_nhwc, ((0, 0), (pad, pad), (pad, pad), (0, 0)))

    out_rows = fused_branches(
        xpad, params["wd_stack"], params["w_1x1"], params["w_edge"],
        img, edge_rows, params["bias_all"],
        H=H, W=W, Cin=Cin, R=R, rates=rates, pad=pad, block_h=block_h)

    out_nhwc = out_rows.reshape(N, H, W, cout)
    # TODO(synk): return NHWC directly if the consumer allows; the transpose is
    # only to preserve the PyTorch module's NCHW output layout.
    return jnp.transpose(out_nhwc, (0, 3, 1, 2))


# ----------------------------------------------------------------------------
# Pure-JAX reference (lax conv, same bf16 operand quantization) for checking
# ----------------------------------------------------------------------------
def aspp_reference(x_nchw, edge_nchw, params):
    N, Cin, H, W = x_nchw.shape
    R = params["reduction_dim"]
    rates = params["rates"]
    x_bf = x_nchw.astype(jnp.bfloat16)
    outs = []

    # image pooling branch (f32 except the shared bf16 cast of x)
    pooled = jnp.mean(x_bf.astype(jnp.float32), axis=(2, 3))           # (N, Cin)
    img = jnp.maximum(pooled @ params["w_img"] + params["b_img"], 0.0)  # (N, R)
    outs.append(jnp.broadcast_to(img[:, :, None, None], (N, R, H, W)))

    # edge branch (f32)
    edge_rs = bilinear_align_corners(edge_nchw.astype(jnp.float32), H, W)
    w_e = params["w_edge_oihw"] * params["s_edge"][:, None, None, None]
    e = lax.conv_general_dilated(edge_rs, w_e, (1, 1), ((0, 0), (0, 0)),
                                 dimension_numbers=("NCHW", "OIHW", "NCHW"))
    outs.append(jnp.maximum(e + params["b_edge"][None, :, None, None], 0.0))

    # 1x1 branch (bf16 operands, f32 accumulation -- matches the kernel)
    w1 = (params["w_1x1_oihw"] * params["s_1x1"][:, None, None, None]).astype(jnp.bfloat16)
    y = lax.conv_general_dilated(x_bf, w1, (1, 1), ((0, 0), (0, 0)),
                                 dimension_numbers=("NCHW", "OIHW", "NCHW"),
                                 preferred_element_type=jnp.float32)
    outs.append(jnp.maximum(y + params["b_1x1"][None, :, None, None], 0.0))

    # dilated branches
    for i, r in enumerate(rates):
        wd = (params["w_d_oihw"][i] * params["s_d"][i][:, None, None, None]).astype(jnp.bfloat16)
        y = lax.conv_general_dilated(x_bf, wd, (1, 1), ((r, r), (r, r)),
                                     rhs_dilation=(r, r),
                                     dimension_numbers=("NCHW", "OIHW", "NCHW"),
                                     preferred_element_type=jnp.float32)
        outs.append(jnp.maximum(y + params["b_d"][i][None, :, None, None], 0.0))

    return jnp.concatenate(outs, axis=1)


# ----------------------------------------------------------------------------
if __name__ == "__main__":
    key = jax.random.PRNGKey(0)
    k_x, k_e, k_p = jax.random.split(key, 3)

    N, Cin, H, W = 2, 4, 16, 16
    R = 32
    x = jax.random.normal(k_x, (N, Cin, H, W), dtype=jnp.float32)
    edge = jax.random.normal(k_e, (N, 1, 8, 8), dtype=jnp.float32)  # resized to HxW inside

    params = make_params(k_p, in_dim=Cin, reduction_dim=R, output_stride=16)

    # block_h=8 -> two row-tiles per image; block_hw=128 -> two GAP tiles
    out = jax.block_until_ready(aspp_forward(x, edge, params, block_h=8, block_hw=128))
    assert out.shape == (N, 6 * R, H, W), out.shape

    ref = jax.block_until_ready(aspp_reference(x, edge, params))
    np.testing.assert_allclose(np.asarray(out), np.asarray(ref), rtol=2e-3, atol=2e-3)

    print("KERNEL_OK")
</pallas_src>

<mosaic_0001>
module attributes {stable_mosaic.version = 11 : i64} {
  func.func @_gap_img_kernel(%arg0: i32, %arg1: i32, %arg2: memref<1x128x4xbf16, #tpu.memory_space<vmem>>, %arg3: memref<4x32xf32, #tpu.memory_space<vmem>>, %arg4: memref<1x32xf32, #tpu.memory_space<vmem>>, %arg5: memref<1x1x32xf32, #tpu.memory_space<vmem>>, %arg6: memref<1x4xf32, #tpu.memory_space<vmem>>) attributes {dimension_semantics = [#tpu.dimension_semantics<parallel>, #tpu.dimension_semantics<arbitrary>], iteration_bounds = array<i64: 2, 2>, scalar_prefetch = 0 : i64, scratch_operands = 1 : i64, tpu.core_type = #tpu.core_type<tc>, window_params = [{transform_indices = @transform_0, window_bounds = array<i64: 1, 128, 4>}, {pipeline_mode = #tpu.pipeline_mode<synchronous>, transform_indices = @transform_1, window_bounds = array<i64: 4, 32>}, {pipeline_mode = #tpu.pipeline_mode<synchronous>, transform_indices = @transform_2, window_bounds = array<i64: 1, 32>}, {transform_indices = @transform_3, window_bounds = array<i64: 1, 1, 32>}]} {
    %c0_i32 = arith.constant 0 : i32
    %0 = arith.cmpi eq, %arg1, %c0_i32 : i32
    %1 = arith.extui %0 : i1 to i32
    %c0_i32_0 = arith.constant 0 : i32
    %2 = arith.cmpi ne, %1, %c0_i32_0 : i32
    scf.if %2 {
      %cst_8 = arith.constant 0.000000e+00 : f32
      %14 = vector.broadcast %cst_8 : f32 to vector<1x4xf32>
      %c0_9 = arith.constant 0 : index
      %c0_10 = arith.constant 0 : index
      %15 = vector.load %arg6[%c0_9, %c0_10] : memref<1x4xf32, #tpu.memory_space<vmem>>, vector<1x4xf32>
      tpu.vector_store %arg6[%c0_9, %c0_10], %14 {strides = array<i32>} : memref<1x4xf32, #tpu.memory_space<vmem>>, vector<1x4xf32>,
    } else {
    }
    %c0 = arith.constant 0 : index
    %c0_1 = arith.constant 0 : index
    %3 = vector.load %arg6[%c0, %c0_1] : memref<1x4xf32, #tpu.memory_space<vmem>>, vector<1x4xf32>
    %c0_2 = arith.constant 0 : index
    %c0_3 = arith.constant 0 : index
    %c0_4 = arith.constant 0 : index
    %4 = vector.load %arg2[%c0_2, %c0_3, %c0_4] : memref<1x128x4xbf16, #tpu.memory_space<vmem>>, vector<1x128x4xbf16>
    %5 = vector.shape_cast %4 : vector<1x128x4xbf16> to vector<128x4xbf16>
    %6 = arith.extf %5 : vector<128x4xbf16> to vector<128x4xf32>
    %cst = arith.constant dense<0.000000e+00> : vector<4xf32>
    %7 = vector.multi_reduction <add>, %6, %cst [0] : vector<128x4xf32> to vector<4xf32>
    %8 = vector.shape_cast %7 : vector<4xf32> to vector<1x4xf32>
    %9 = arith.addf %3, %8 : vector<1x4xf32>
    %c0_5 = arith.constant 0 : index
    %c0_6 = arith.constant 0 : index
    %10 = vector.load %arg6[%c0_5, %c0_6] : memref<1x4xf32, #tpu.memory_space<vmem>>, vector<1x4xf32>
    tpu.vector_store %arg6[%c0_5, %c0_6], %9 {strides = array<i32>} : memref<1x4xf32, #tpu.memory_space<vmem>>, vector<1x4xf32>,
    %c1_i32 = arith.constant 1 : i32
    %11 = arith.cmpi eq, %arg1, %c1_i32 : i32
    %12 = arith.extui %11 : i1 to i32
    %c0_i32_7 = arith.constant 0 : i32
    %13 = arith.cmpi ne, %12, %c0_i32_7 : i32
    scf.if %13 {
      %c0_8 = arith.constant 0 : index
      %c0_9 = arith.constant 0 : index
      %14 = vector.load %arg6[%c0_8, %c0_9] : memref<1x4xf32, #tpu.memory_space<vmem>>, vector<1x4xf32>
      %cst_10 = arith.constant 3.906250e-03 : f32
      %15 = vector.broadcast %cst_10 : f32 to vector<1x4xf32>
      %16 = arith.mulf %14, %15 : vector<1x4xf32>
      %c0_11 = arith.constant 0 : index
      %c0_12 = arith.constant 0 : index
      %17 = vector.load %arg3[%c0_11, %c0_12] : memref<4x32xf32, #tpu.memory_space<vmem>>, vector<4x32xf32>
      %cst_13 = arith.constant dense<0.000000e+00> : vector<1x32xf32>
      %18 = tpu.matmul %16, %17, %cst_13 {dimension_numbers = #tpu.dot_dimension_numbers<[1], [0], [0], [1], [0, 0, 1, 1], [], []>} : vector<1x4xf32>, vector<4x32xf32>, vector<1x32xf32> -> vector<1x32xf32>
      %c0_14 = arith.constant 0 : index
      %c0_15 = arith.constant 0 : index
      %19 = vector.load %arg4[%c0_14, %c0_15] : memref<1x32xf32, #tpu.memory_space<vmem>>, vector<1x32xf32>
      %20 = arith.addf %18, %19 : vector<1x32xf32>
      %cst_16 = arith.constant 0.000000e+00 : f32
      %21 = vector.broadcast %cst_16 : f32 to vector<1x32xf32>
      %22 = arith.maximumf %20, %21 : vector<1x32xf32>
      %23 = vector.shape_cast %22 : vector<1x32xf32> to vector<1x1x32xf32>
      %c0_17 = arith.constant 0 : index
      %c0_18 = arith.constant 0 : index
      %c0_19 = arith.constant 0 : index
      %24 = vector.load %arg5[%c0_17, %c0_18, %c0_19] : memref<1x1x32xf32, #tpu.memory_space<vmem>>, vector<1x1x32xf32>
      tpu.vector_store %arg5[%c0_17, %c0_18, %c0_19], %23 {strides = array<i32>} : memref<1x1x32xf32, #tpu.memory_space<vmem>>, vector<1x1x32xf32>,
    } else {
    }
    return
  }
  func.func @transform_0(%arg0: i32, %arg1: i32) -> (i32, i32, i32) {
    %c0_i32 = arith.constant 0 : i32
    %c0_i32_0 = arith.constant 0 : i32
    return %arg0, %arg1, %c0_i32 : i32, i32, i32
  }
  func.func @transform_1(%arg0: i32, %arg1: i32) -> (i32, i32) {
    %c0_i32 = arith.constant 0 : i32
    %c0_i32_0 = arith.constant 0 : i32
    %c0_i32_1 = arith.constant 0 : i32
    return %c0_i32, %c0_i32_0 : i32, i32
  }
  func.func @transform_2(%arg0: i32, %arg1: i32) -> (i32, i32) {
    %c0_i32 = arith.constant 0 : i32
    %c0_i32_0 = arith.constant 0 : i32
    %c0_i32_1 = arith.constant 0 : i32
    return %c0_i32, %c0_i32_0 : i32, i32
  }
  func.func @transform_3(%arg0: i32, %arg1: i32) -> (i32, i32, i32) {
    %c0_i32 = arith.constant 0 : i32
    %c0_i32_0 = arith.constant 0 : i32
    %c0_i32_1 = arith.constant 0 : i32
    return %arg0, %c0_i32, %c0_i32_0 : i32, i32, i32
  }
}

</mosaic_0001>

<bundles_post_ra>
// kernel: tpu_custom_call.1
= control target key start
LH: loop header
LB: loop body
LE: loop exit
PB: predicated region body
PF: predicated region fallthrough
CT: control target
= control target key end

     0   :  { %8 = vsyncpa [#allocation4], 0  ;;  %s802_s0 = inlined_call_operand.vmem [shape: bf16[2,256,4], index: 0, kind: input, shape index: {}]   ;;  %s803_s1 = inlined_call_operand.vmem [shape: f32[4,32], index: 1, kind: input, shape index: {}]   ;;  %s804_s2 = inlined_call_operand.vmem [shape: f32[1,32], index: 2, kind: input, shape index: {}]   ;;  %s805_s3 = inlined_call_operand.hbm [shape: f32[2,1,32], index: 3, kind: output, shape index: {}]  }
   0x1   :  { %10 = vsyncpa [#allocation4 + $0x1], 0  ;;  %s641_s12 = smov 0   ;;  %s643_s13 = smov 0  }
   0x2   :  { %s645_s14 = smov 0   ;;  %s647_s15 = smov 0  }
   0x3   :  { %s649_s16 = smov 0   ;;  %s651_s17 = smov 0  }
   0x4   :  { %s653_s18 = smov 0   ;;  %s655_s19 = smov 0  }
   0x5 LB: > { %s399_s20 = sadd.s32 4294967295, %s618_s19   ;;  %s400_s21 = sadd.s32 4294967294, %s618_s19   ;;  %s618_s19 = sphi %s655_s19, %s16_s19   ;;  %s614_s18 = sphi %s653_s18, %s814_s18   ;;  %s610_s17 = sphi %s651_s17, %s813_s17   ;;  %s606_s16 = sphi %s649_s16, %s812_s16   ;;  %s602_s15 = sphi %s647_s15, %s811_s15   ;;  %s598_s14 = sphi %s645_s14, %s810_s14   ;;  %s594_s13 = sphi %s643_s13, %s809_s13   ;;  %s590_s12 = sphi %s641_s12, %s808_s12  }
   0x6   : > { %s25_s22 = sadd.s32 1, %s610_s17  ;;  %s28_s23 = sadd.s32 1, %s614_s18 }
   0x7   : > { %p26_p0 = scmp.ge.s32.totalorder %s25_s22, 2  ;;  %p115_p1 = scmp.ne.s32.totalorder %s598_s14, %s594_s13 }
   0x8   : > { %p116_p2 = scmp.eq.s32.totalorder %s399_s20, 3  ;;  %p121_p4 = scmp.ne.s32.totalorder %s594_s13, %s590_s12 }
   0x9   : > { %s816_s22 = smov (%p26_p0, %s25_s22), 0  ;;  %s818_s23 = smov (!%p26_p0, %s28_s23), %s614_s18 }
   0xa   : > { %p690_p3 = por %p116_p2, %p115_p1  ;;  %p30_p5 = scmp.ge.s32.totalorder %s818_s23, 2 }
   0xb   : > { %p122_p6 = scmp.eq.s32.totalorder %s400_s21, 3  ;;  %p403_p7 = scmp.ge.s32.totalorder %s618_s19, 1 }
   0xc   : > { %p159_p8 = scmp.lt.s32.totalorder %s618_s19, 5  ;;  %s820_s23 = smov (%p30_p5, %s818_s23), 0 }
   0xd   : > { %p700_p9 = por %p122_p6, %p121_p4  ;;  %s102_s26 = ssub.s32 %s614_s18, %s820_s23 }
   0xe   : > { %p160_p10 = pnand %p403_p7, %p159_p8  ;;  %s105_s27 = sadd.s32 1, %s598_s14 }
   0xf   : > { %p103_p11 = scmp.eq.s32.totalorder %s102_s26, 0  ;;  %s184_s29 = sand.u32 (!%p160_p10), 1, %s594_s13  }
  0x10   : > { %163 = sbr.rel (%p160_p10) target bundleno = 232 (0xe8), region = 32  ;;  %s404_s30 = sshll.u32 (!%p160_p10), %s602_s15, 4 }
  0x11   : > { %s708_s28 = scalar_select %p103_p11, %s598_s14, %s105_s27  }
  0x12   : > { %p187_p12 = scmp.lt.s32.totalorder (!%p160_p10), %s606_s16, 1  ;;  %p189_p13 = scmp.lt.s32.totalorder (!%p160_p10), %s404_s30, 31 }
  0x13   : > { %s721_s11 = scalar_lea.vmem (!%p160_p10), [#allocation3], %s184_s29  ;;  %p407_p0 = scmp.ne.s32.totalorder (!%p160_p10), %s602_s15, 0 }
  0x15   : > { %s188_s4 = scalar_select %p187_p12, %s606_s16, 1 }
  0x16   : > { %s822_s30 = smov (!%p189_p13, %s404_s30), 31  ;;  %199 = sbr.rel (%p407_p0) target bundleno = 29 (0x1d), region = 36 }
  0x17   : > { %s405_s5 = sshll.u32 %s188_s4, 5 }
  0x18   : > { %s192_s6 = sadd.s32 %s405_s5, %s822_s30 }
  0x19   : > { %s406_s7 = sshll.u32 %s192_s6, 2 }
  0x1a   : > { %s717_s10 = scalar_lea.vmem %s802_s0, %s406_s7 }
  0x1b   : > { %vm200_vm0 = vcmask 24576   ;;  %v620_v0 = vmov 0.0  }
  0x1c   : > { %201 = vst.msk [vmem:[#allocation2] sm:$0x1] %vm200_vm0, %v620_v0 }
  0x1d PF: > { %v414_v1 = vld [vmem:[%s717_s10] sm:$0xff]   ;;  %v445_v2 = vld [vmem:[%s717_s10 + $0x8] sm:$0xff]   ;;  %v446_v6 = vld [vmem:[%s717_s10 + $0x10] sm:$0xff]   ;;  %vm235_vm1 = vcmask 31744   ;;  %vm274_vm2 = vcmask 24576   ;;  %p408_p1 = scmp.ne.s32.totalorder %s602_s15, 1 }
  0x1e   : > { %v415_v3 = vunpack.c.l.bf16 %v414_v1  ;;  %v416_v4 = vunpack.c.h.bf16 %v414_v1  ;;  %v419_v5 = vunpack.c.l.bf16 %v445_v2  ;;  %v420_v7 = vunpack.c.h.bf16 %v445_v2  ;;  %v447_v12 = vld [vmem:[%s717_s10 + $0x18] sm:$0xff]   ;;  %v448_v19 = vld [vmem:[%s717_s10 + $0x20] sm:$0xff]   ;;  %v449_v26 = vld [vmem:[%s717_s10 + $0x28] sm:$0xff]  }
  0x1f   : > { %v423_v8 = vunpack.c.l.bf16 %v446_v6  ;;  %v424_v14 = vunpack.c.h.bf16 %v446_v6  ;;  %v427_v17 = vunpack.c.l.bf16 %v447_v12  ;;  %v428_v21 = vunpack.c.h.bf16 %v447_v12  ;;  %v450_v33 = vld [vmem:[%s717_s10 + $0x30] sm:$0xff]   ;;  %v451_v40 = vld [vmem:[%s717_s10 + $0x38] sm:$0xff]  }
  0x20   : > { %v236_v9 = vsel %vm235_vm1, %v415_v3, 0.0  ;;  %v237_v10 = vsel %vm235_vm1, %v416_v4, 0.0  ;;  %v239_v11 = vsel %vm235_vm1, %v419_v5, 0.0  ;;  %v241_v15 = vsel %vm235_vm1, %v420_v7, 0.0 }
  0x21   : > { %v238_v13 = vadd.f32 %v237_v10, %v236_v9  ;;  %v243_v18 = vsel %vm235_vm1, %v423_v8, 0.0  ;;  %v245_v22 = vsel %vm235_vm1, %v424_v14, 0.0  ;;  %v431_v24 = vunpack.c.l.bf16 %v448_v19 }
  0x22   : > { %v247_v25 = vsel %vm235_vm1, %v427_v17, 0.0  ;;  %v432_v28 = vunpack.c.h.bf16 %v448_v19  ;;  %v249_v29 = vsel %vm235_vm1, %v428_v21, 0.0  ;;  %v435_v31 = vunpack.c.l.bf16 %v449_v26 }
  0x23   : > { %v240_v16 = vadd.f32 %v239_v11, %v238_v13  ;;  %v251_v32 = vsel %vm235_vm1, %v431_v24, 0.0  ;;  %v436_v35 = vunpack.c.h.bf16 %v449_v26  ;;  %v439_v38 = vunpack.c.l.bf16 %v450_v33  ;;  %v202_v61 = vld [vmem:[#allocation2] sm:$0x1] }
  0x24   : > { %v253_v36 = vsel %vm235_vm1, %v432_v28, 0.0  ;;  %v255_v39 = vsel %vm235_vm1, %v435_v31, 0.0  ;;  %v440_v42 = vunpack.c.h.bf16 %v450_v33  ;;  %v443_v45 = vunpack.c.l.bf16 %v451_v40 }
  0x25   : > { %v242_v20 = vadd.f32 %v241_v15, %v240_v16  ;;  %v257_v43 = vsel %vm235_vm1, %v436_v35, 0.0  ;;  %v259_v46 = vsel %vm235_vm1, %v439_v38, 0.0  ;;  %v444_v48 = vunpack.c.h.bf16 %v451_v40 }
  0x26   : > { %v261_v49 = vsel %vm235_vm1, %v440_v42, 0.0  ;;  %v263_v51 = vsel %vm235_vm1, %v443_v45, 0.0 }
  0x27   : > { %v244_v23 = vadd.f32 %v243_v18, %v242_v20  ;;  %v265_v53 = vsel %vm235_vm1, %v444_v48, 0.0 }
  0x29   : > { %v246_v27 = vadd.f32 %v245_v22, %v244_v23 }
  0x2b   : > { %v248_v30 = vadd.f32 %v247_v25, %v246_v27 }
  0x2d   : > { %v250_v34 = vadd.f32 %v249_v29, %v248_v30 }
  0x2f   : > { %v252_v37 = vadd.f32 %v251_v32, %v250_v34 }
  0x31   : > { %v254_v41 = vadd.f32 %v253_v36, %v252_v37 }
  0x33   : > { %v256_v44 = vadd.f32 %v255_v39, %v254_v41 }
  0x35   : > { %v258_v47 = vadd.f32 %v257_v43, %v256_v44 }
  0x37   : > { %v260_v50 = vadd.f32 %v259_v46, %v258_v47 }
  0x39   : > { %v262_v52 = vadd.f32 %v261_v49, %v260_v50 }
  0x3b   : > { %v264_v54 = vadd.f32 %v263_v51, %v262_v52 }
  0x3d   : > { %v266_v55 = vadd.f32 %v265_v53, %v264_v54 }
  0x3f   : > { %v267_v56 = vrot.slane %v266_v55, 4 }
  0x41   : > { %v268_v57 = vadd.f32 %v267_v56, %v266_v55 }
  0x43   : > { %v269_v58 = vrot.slane %v268_v57, 2 }
  0x45   : > { %v270_v59 = vadd.f32 %v269_v58, %v268_v57 }
  0x47   : > { %v271_v60 = vrot.slane %v270_v59, 1 }
  0x49   : > { %v272_v62 = vadd.f32 %v271_v60, %v270_v59  ;;  %279 = sbr.rel (%p408_p1) target bundleno = 218 (0xda), region = 40 }
  0x4b   : > { %v273_v63 = vadd.f32 %v272_v62, %v202_v61 }
  0x4d   : > { %275 = vst.msk [vmem:[#allocation2] sm:$0x1] %vm274_vm2, %v273_v63 }
  0x4e   : > { %v282_v0 = vld [vmem:[%s803_s1] sm:$0xf]  ;;  %vm287_vm3 = vcmask 1043456   ;;  %vm312_vm4 = vcmask 253952  }
  0x4f   : > { %409 = vmatpush.msk.msra.mxu0 %vm287_vm3, %v282_v0  ;;  %v283_v3 = vld [vmem:[%s804_s2] sm:$0x1] }
  0x54   : > { %v280_v1 = vld [vmem:[#allocation2] sm:$0x1] }
  0x55   : > { %v281_v2 = vmul.f32 0.00390625, %v280_v1 }
  0x57   : > { %410 = vmatmul.msk.f32.vlgmr.msra.gmra.mxu0 %vm235_vm1, %v281_v2 }
  0xd4   : > { %v308_v4 = vpop.f32.mrf.mxu0 }
  0xd5   : > { %v309_v5 = vadd.f32 %v308_v4, %v283_v3 }
  0xd7   : > { %v311_v6 = vmax.f32 %v309_v5, 0.0 }
  0xd9   : > { %313 = vst.msk [vmem:[%s721_s11] sm:$0x1] %vm312_vm4, %v311_v6 }
  0xda PF: > { %s323_s4 = scalar_lea.hbm %s805_s3, %s606_s16  ;;  %s325_s5 = sshll.u32 %s721_s11, 4  ;;  %s326_s5 = int_to_ptr.vmem [resolvable:$true] %s325_s5 }
  0xdb   : > { %s327_s6 = sshll.u32 %s323_s4, 4  ;;  %s315_s7 = scalar_lea.sflag [#allocation4], %s184_s29  ;;  %s328_s6 = int_to_ptr.hbm [resolvable:$true] %s327_s6 }
  0xdc   : > { %s538_s8 = sshra.s32 %s328_s6, 4  ;;  %s544_s21 = scalar_lea.hbm %s805_s3, 2  ;;  %s539_s8 = int_to_ptr.hbm [resolvable:$true] %s538_s8 }
  0xdd   : > { %s540_s9 = scalar_lea.hbm %s539_s8, 1  ;;  %p545_p6 = scmp.lt.s32.totalorder %s539_s8, %s805_s3 }
  0xde   : > { %p541_p2 = scmp.ne.s32.totalorder %s539_s8, %s540_s9  ;;  %p546_p7 = scmp.lt.s32.totalorder %s544_s21, %s540_s9 }
  0xe0   : > { %p542_p4 = pnand %p541_p2, %p690_p3  ;;  %p547_p8 = por %p546_p7, %p545_p6 }
  0xe2   : > { %p543_p5 = pneg %p542_p4 }
  0xe4   : > { %p548_p10 = pnand %p547_p8, %p543_p5 }
  0xe6   : > { %551 = shalt.err (!%p548_p10)
}
  0xe7   : > { %452 = dma.vmem_to_hbm [thread:$0]  (%p690_p3), %s326_s5, 16, %s328_s6, %s315_s7  }
  0xe8 PF: > { %p458_p11 = scmp.ge.s32.totalorder %s618_s19, 2  ;;  %s339_s16 = sand.u32 1, %s590_s12  }
  0xe9   : > { %s340_s29 = scalar_lea.sflag [#allocation4], %s339_s16 }
  0xea   : > { %p455_p12 = pnand %p458_p11, %p700_p9 }
  0xec   : > { %p456_p13 = pneg %p455_p12 }
  0xee   : > { %585 = dma.done.wait (%p456_p13), %s340_s29, 16  }
  0xef   : > { %587 = vsyncadd (%p456_p13), %s340_s29, 4294967280  ;;  %s16_s19 = sadd.s32 1, %s618_s19   ;;  %s808_s12 = smov %s594_s13 }
  0xf0   : > { %p13_p0 = scmp.ge.s32.totalorder %s16_s19, 6   ;;  %s809_s13 = smov %s598_s14 }
  0xf1   : > { %s810_s14 = smov %s708_s28  ;;  %s811_s15 = smov %s610_s17 }
  0xf2   : > { %s812_s16 = smov %s614_s18  ;;  %s813_s17 = smov %s816_s22 }
  0xf3   : > { %s814_s18 = smov %s820_s23  ;;  %15 = sbr.rel (!%p13_p0) target bundleno = 5 (0x5), region = 75 }
  0xf8   :  { %345 = vsyncpa [#allocation4], 1 }
  0xf9   :  { %347 = vsyncpa [#allocation4 + $0x1], 1 }

</bundles_post_ra>
